<compile_context>
chip_gen: v5e
topology: v5e:2x2
jax: 0.10.0
libtpu: 0.0.40
codegen_flags: <defaults>
</compile_context>

<pallas_src>
import functools

import jax
import jax.numpy as jnp
from jax import lax
from jax.experimental import pallas as pl
from jax.experimental.pallas import tpu as pltpu


def _round_up(x, m):
    return (x + m - 1) // m * m


def _patch_proj_kernel(x_ref, w_ref, b_ref, o_ref, *, precision):
    # x_ref: (TILE_N, K)      flattened patches, (c, kh, kw) order == PyTorch's
    #                         flattening of its (E, C, P, P) conv weight.
    # w_ref: (K, E_pad)       transposed, E-padded conv weight (VMEM resident).
    # b_ref: (1, E_pad)       f32 bias (VMEM resident).
    # o_ref: (TILE_N, E_pad)
    acc = jnp.dot(x_ref[...], w_ref[...],
                  preferred_element_type=jnp.float32, precision=precision)
    o_ref[...] = (acc + b_ref[...]).astype(o_ref.dtype)


def _choose_tile_n(n, target, align, max_rows):
    """Aligned tile size <= max_rows; prefers dividing n; keeps >= 2 grid steps."""
    max_rows = max(align, max_rows // align * align)
    target = max(align, min(_round_up(max(target, 1), align), max_rows))
    if n > align:
        # Keep at least two grid steps so v7x megacore has work for both TCs.
        target = min(target, max(align, _round_up(pl.cdiv(n, 2), align)))
    if n <= target:
        return _round_up(n, align)
    if n % align == 0:
        d = target
        while d >= align:
            if n % d == 0:          # divisor of N -> no pad, no output slice
                return d
            d -= align
    return target


@functools.partial(
    jax.jit,
    static_argnames=("patch_size", "tile_n", "use_bf16", "channels_last",
                     "out_dtype"))
def patch_projection_conv2d(x, weight, bias, patch_size, *, tile_n=None,
                            use_bf16=True, channels_last=False,
                            out_dtype=None):
    """Pallas equivalent of PatchProjectionConv2DLayer.forward.

    x:      (B, C, H, W)
    weight: (E, C, P, P)   PyTorch Conv2d weight layout
    bias:   (E,)
    returns (B, E, H//P, W//P)   (or (B, H//P, W//P, E) if channels_last=True)

    use_bf16=True (default) runs the MXU in bf16 with f32 accumulation — much
    faster and half the LHS HBM traffic, but not bit-identical to f32 Conv2d.
    use_bf16=False keeps exact f32 semantics (HIGHEST-precision matmul).
    """
    B, C, H, W = x.shape
    E = weight.shape[0]
    P = patch_size
    assert H % P == 0 and W % P == 0
    Hp, Wp = H // P, W // P
    N = B * Hp * Wp
    K = C * P * P

    lhs_dtype = jnp.bfloat16 if use_bf16 else x.dtype
    if out_dtype is None:
        out_dtype = x.dtype

    # Cast BEFORE the im2col reshape/transpose so those copies move half bytes.
    if use_bf16:
        x = x.astype(jnp.bfloat16)

    # im2col: (B,C,Hp,P,Wp,P) -> (B,Hp,Wp,C,P,P) -> (N, K)
    # TODO(synk): for very large inputs, fold im2col into the kernel (NHWC
    # input path) to save this activation-sized HBM round trip.
    patches = x.reshape(B, C, Hp, P, Wp, P)
    patches = jnp.transpose(patches, (0, 2, 4, 1, 3, 5)).reshape(N, K)

    w_mat = weight.reshape(E, K).T.astype(lhs_dtype)       # (K, E)
    b_mat = bias.reshape(1, E).astype(jnp.float32)

    # Only E is padded (lane-dense stores, full MXU output columns); K stays
    # un-padded (full-dim block is legal and a K pad would cost a full
    # activation-sized HBM copy).
    E_pad = _round_up(E, 128)
    w_p = jnp.pad(w_mat, ((0, 0), (0, E_pad - E))) if E_pad != E else w_mat
    b_p = jnp.pad(b_mat, ((0, 0), (0, E_pad - E))) if E_pad != E else b_mat

    lhs_bytes = jnp.dtype(lhs_dtype).itemsize
    out_bytes = jnp.dtype(out_dtype).itemsize
    align = 16 if lhs_bytes < 4 else 8      # bf16 packs 16 sublanes per vreg

    # VMEM budget: double-buffered LHS/output tiles + single-buffered
    # weight/bias, under ~40 MiB (headroom on v7x's 64 MiB physical VMEM).
    budget = 40 * 1024 * 1024
    resident = K * E_pad * lhs_bytes + E_pad * 4
    per_row = 2 * (K * lhs_bytes + E_pad * out_bytes)
    max_rows = max(align, (budget - resident) // per_row)

    if tile_n is None:
        tile_n = 2048 if lhs_bytes < 4 else 1024
    TILE_N = _choose_tile_n(N, tile_n, align, max_rows)
    N_pad = _round_up(N, TILE_N)

    patches_p = patches
    if N_pad != N:
        patches_p = jnp.pad(patches_p, ((0, N_pad - N), (0, 0)))

    grid = (N_pad // TILE_N,)

    cost = pl.CostEstimate(
        flops=2 * N_pad * K * E_pad,
        transcendentals=0,
        bytes_accessed=(N_pad * K * lhs_bytes + K * E_pad * lhs_bytes
                        + E_pad * 4 + N_pad * E_pad * out_bytes),
    )

    vmem_needed = (2 * TILE_N * (K * lhs_bytes + E_pad * out_bytes)
                   + resident + (1 << 20))
    vmem_limit = int(min(max(vmem_needed, 32 * 1024 * 1024),
                         48 * 1024 * 1024))

    # Exact f32 Conv2d numerics when not using bf16 inputs.
    precision = None if use_bf16 else lax.Precision.HIGHEST
    kernel = functools.partial(_patch_proj_kernel, precision=precision)

    out_flat = pl.pallas_call(
        kernel,
        out_shape=jax.ShapeDtypeStruct((N_pad, E_pad), out_dtype),
        grid_spec=pltpu.PrefetchScalarGridSpec(
            num_scalar_prefetch=0,
            grid=grid,
            in_specs=[
                # LHS: one (TILE_N, K) tile per grid step (pipelined DMA).
                pl.BlockSpec((TILE_N, K), lambda i: (i, 0)),
                # Weight / bias: constant index_map -> VMEM resident; single
                # buffer (the second buffer would never be used).
                pl.BlockSpec((K, E_pad), lambda i: (0, 0),
                             pipeline_mode=pl.Buffered(1)),
                pl.BlockSpec((1, E_pad), lambda i: (0, 0),
                             pipeline_mode=pl.Buffered(1)),
            ],
            out_specs=pl.BlockSpec((TILE_N, E_pad), lambda i: (i, 0)),
        ),
        compiler_params=pltpu.CompilerParams(
            dimension_semantics=("parallel",),   # megacore sharding on v7x
            vmem_limit_bytes=vmem_limit,
        ),
        cost_estimate=cost,
    )(patches_p, w_p, b_p)

    # Slice off padding (no-op when TILE_N divides N and E % 128 == 0), then
    # back to Conv2d's NCHW output unless the consumer accepts channels-last.
    out = out_flat[:N, :E] if (N_pad != N or E_pad != E) else out_flat
    out = out.reshape(B, Hp, Wp, E)
    if not channels_last:
        out = jnp.transpose(out, (0, 3, 1, 2))
    return out


def _reference(x, weight, bias, P):
    E = weight.shape[0]
    y = lax.conv_general_dilated(
        x, weight, window_strides=(P, P), padding="VALID",
        dimension_numbers=("NCHW", "OIHW", "NCHW"),
        precision=lax.Precision.HIGHEST)
    return y + bias.reshape(1, E, 1, 1)


if __name__ == "__main__":
    key = jax.random.PRNGKey(0)
    kx, kw, kb, kx2, kw2 = jax.random.split(key, 5)

    # --- config 1: exact-f32 path (bit-level Conv2d semantics) -------------
    B, C, H, W = 2, 4, 16, 16
    P, E = 4, 32
    x = jax.random.normal(kx, (B, C, H, W), dtype=jnp.float32)
    weight = jax.random.normal(kw, (E, C, P, P), dtype=jnp.float32) * 0.05
    bias = jax.random.normal(kb, (E,), dtype=jnp.float32) * 0.05

    out = jax.block_until_ready(
        patch_projection_conv2d(x, weight, bias, P, use_bf16=False))
    assert out.shape == (B, E, H // P, W // P), out.shape
    ref = _reference(x, weight, bias, P)
    assert jnp.allclose(out, ref, atol=1e-4, rtol=1e-4)

    # --- config 2: default bf16-MXU path, multi-tile grid (N=128, tile=64) -
    B2, C2, H2, W2 = 2, 3, 32, 32
    x2 = jax.random.normal(kx2, (B2, C2, H2, W2), dtype=jnp.float32)
    w2 = jax.random.normal(kw2, (E, C2, P, P), dtype=jnp.float32) * 0.05
    out2 = jax.block_until_ready(
        patch_projection_conv2d(x2, w2, bias, P, tile_n=64))  # bf16 default
    ref2 = _reference(x2, w2, bias, P)
    assert out2.shape == ref2.shape
    # bf16 matmul inputs -> looser tolerance vs. the f32 conv reference.
    assert jnp.allclose(out2, ref2, atol=5e-2, rtol=5e-2)

    print("KERNEL_OK")
</pallas_src>

<mosaic_0001>
module attributes {stable_mosaic.version = 11 : i64} {
  func.func @_patch_proj_kernel(%arg0: i32, %arg1: memref<16x64xf32, #tpu.memory_space<vmem>>, %arg2: memref<64x128xf32, #tpu.memory_space<vmem>>, %arg3: memref<1x128xf32, #tpu.memory_space<vmem>>, %arg4: memref<16x128xf32, #tpu.memory_space<vmem>>) attributes {dimension_semantics = [#tpu.dimension_semantics<parallel>], iteration_bounds = array<i64: 2>, scalar_prefetch = 0 : i64, scratch_operands = 0 : i64, tpu.core_type = #tpu.core_type<tc>, window_params = [{transform_indices = @transform_0, window_bounds = array<i64: 16, 64>}, {pipeline_mode = #tpu.pipeline_mode<synchronous>, transform_indices = @transform_1, window_bounds = array<i64: 64, 128>}, {pipeline_mode = #tpu.pipeline_mode<synchronous>, transform_indices = @transform_2, window_bounds = array<i64: 1, 128>}, {transform_indices = @transform_3, window_bounds = array<i64: 16, 128>}]} {
    %c0 = arith.constant 0 : index
    %c0_0 = arith.constant 0 : index
    %0 = vector.load %arg1[%c0, %c0_0] : memref<16x64xf32, #tpu.memory_space<vmem>>, vector<16x64xf32>
    %c0_1 = arith.constant 0 : index
    %c0_2 = arith.constant 0 : index
    %1 = vector.load %arg2[%c0_1, %c0_2] : memref<64x128xf32, #tpu.memory_space<vmem>>, vector<64x128xf32>
    %cst = arith.constant dense<0.000000e+00> : vector<16x128xf32>
    %2 = tpu.matmul %0, %1, %cst {dimension_numbers = #tpu.dot_dimension_numbers<[1], [0], [0], [1], [0, 0, 1, 1], [], []>, precision = #tpu.contract_precision<fp32>} : vector<16x64xf32>, vector<64x128xf32>, vector<16x128xf32> -> vector<16x128xf32>
    %c0_3 = arith.constant 0 : index
    %c0_4 = arith.constant 0 : index
    %3 = vector.load %arg3[%c0_3, %c0_4] : memref<1x128xf32, #tpu.memory_space<vmem>>, vector<1x128xf32>
    %4 = vector.broadcast %3 : vector<1x128xf32> to vector<16x128xf32>
    %5 = arith.addf %2, %4 : vector<16x128xf32>
    %c0_5 = arith.constant 0 : index
    %c0_6 = arith.constant 0 : index
    %6 = vector.load %arg4[%c0_5, %c0_6] : memref<16x128xf32, #tpu.memory_space<vmem>>, vector<16x128xf32>
    tpu.vector_store %arg4[%c0_5, %c0_6], %5 {strides = array<i32>} : memref<16x128xf32, #tpu.memory_space<vmem>>, vector<16x128xf32>,
    return
  }
  func.func @transform_0(%arg0: i32) -> (i32, i32) {
    %c0_i32 = arith.constant 0 : i32
    %c0_i32_0 = arith.constant 0 : i32
    return %arg0, %c0_i32 : i32, i32
  }
  func.func @transform_1(%arg0: i32) -> (i32, i32) {
    %c0_i32 = arith.constant 0 : i32
    %c0_i32_0 = arith.constant 0 : i32
    %c0_i32_1 = arith.constant 0 : i32
    return %c0_i32, %c0_i32_0 : i32, i32
  }
  func.func @transform_2(%arg0: i32) -> (i32, i32) {
    %c0_i32 = arith.constant 0 : i32
    %c0_i32_0 = arith.constant 0 : i32
    %c0_i32_1 = arith.constant 0 : i32
    return %c0_i32, %c0_i32_0 : i32, i32
  }
  func.func @transform_3(%arg0: i32) -> (i32, i32) {
    %c0_i32 = arith.constant 0 : i32
    %c0_i32_0 = arith.constant 0 : i32
    return %arg0, %c0_i32 : i32, i32
  }
}

</mosaic_0001>

<bundles_post_ra>
// kernel: patch_projection_conv2d.1
= control target key start
LH: loop header
LB: loop body
LE: loop exit
PB: predicated region body
PF: predicated region fallthrough
CT: control target
= control target key end

     0   :  { %8 = vsyncpa [#allocation3], 0  ;;  %s909_s0 = inlined_call_operand.vmem [shape: f32[32,64], index: 0, kind: input, shape index: {}]   ;;  %s910_s1 = inlined_call_operand.vmem [shape: f32[64,128], index: 1, kind: input, shape index: {}]   ;;  %s911_s2 = inlined_call_operand.vmem [shape: f32[1,128], index: 2, kind: input, shape index: {}]   ;;  %s912_s3 = inlined_call_operand.hbm [shape: f32[32,128], index: 3, kind: output, shape index: {}]  }
   0x1   :  { %10 = vsyncpa [#allocation3 + $0x1], 0  ;;  %s698_s12 = smov 0   ;;  %s700_s13 = smov 0  }
   0x2   :  { %s702_s14 = smov 0   ;;  %s704_s15 = smov 0  }
   0x3 LB: > { %s719_s16 = sadd.s32 4294967295, %s674_s15   ;;  %s541_s17 = sadd.s32 4294967294, %s674_s15   ;;  %s674_s15 = sphi %s704_s15, %s918_s15   ;;  %s670_s14 = sphi %s702_s14, %s917_s14   ;;  %s666_s13 = sphi %s700_s13, %s916_s13   ;;  %s662_s12 = sphi %s698_s12, %s915_s12  }
   0x4   : > { %s723_s18 = sadd.s32 1, %s674_s15   ;;  %s91_s19 = sadd.s32 1, %s670_s14 }
   0x5   : > { %s88_s20 = ssub.s32 %s674_s15, %s723_s18  ;;  %p101_p0 = scmp.ne.s32.totalorder %s670_s14, %s666_s13 }
   0x6   : > { %p89_p1 = scmp.eq.s32.totalorder %s88_s20, 0  ;;  %p102_p2 = scmp.eq.s32.totalorder %s719_s16, 1 }
   0x7   : > { %p107_p3 = scmp.ne.s32.totalorder %s666_s13, %s662_s12  ;;  %p108_p4 = scmp.eq.s32.totalorder %s541_s17, 1 }
   0x8   : > { %s734_s21 = scalar_select %p89_p1, %s670_s14, %s91_s19  }
   0x9   : > { %p736_p5 = por %p102_p2, %p101_p0  ;;  %p740_p6 = por %p108_p4, %p107_p3 }
   0xa   : > { %p544_p7 = scmp.ge.s32.totalorder %s674_s15, 1  ;;  %p141_p8 = scmp.lt.s32.totalorder %s674_s15, 3 }
   0xc   : > { %p142_p9 = pnand %p544_p7, %p141_p8 }
   0xd   : > { %s546_s30 = sshll.u32 (!%p142_p9), %s719_s16, 1  ;;  %s162_s29 = sand.u32 (!%p142_p9), 1, %s666_s13  }
   0xe   : > { %145 = sbr.rel (%p142_p9) target bundleno = 199 (0xc7), region = 32  ;;  %p166_p10 = scmp.lt.s32.totalorder (!%p142_p9), %s546_s30, 3 }
   0xf   : > { %s553_s4 = sshll.u32 (!%p142_p9), %s719_s16, 4  ;;  %s464_s16 = scalar_lea.sflag (!%p142_p9), [#allocation3], %s162_s29 }
  0x10   : > { %s475_s7 = scalar_lea.hbm (!%p142_p9), %s912_s3, %s553_s4  ;;  %s632_s24 = scalar_lea.hbm (!%p142_p9), %s912_s3, 32 }
  0x11   : > { %s478_s10 = sshll.u32 (!%p142_p9), %s475_s7, 4  ;;  %s479_s10 = int_to_ptr.hbm [resolvable:$true] %s478_s10 }
  0x12   : > { %s626_s11 = sshra.s32 (!%p142_p9), %s479_s10, 4  ;;  %s627_s11 = int_to_ptr.hbm [resolvable:$true] %s626_s11 }
  0x13   : > { %v181_v0 = vld [vmem:[%s910_s1 + $0x38] sm:$0xff]  ;;  %v180_v1 = vld [vmem:[%s910_s1 + $0x30] sm:$0xff]  ;;  %v179_v2 = vld [vmem:[%s910_s1 + $0x28] sm:$0xff]  ;;  %s920_s30 = smov (!%p166_p10, %s546_s30), 3  ;;  %vm186_vm0 = vcmask 523264   ;;  %s628_s17 = scalar_lea.hbm %s627_s11, 16 }
  0x14   : > { %v756_v3 = vand.u32 4294901760, %v181_v0  ;;  %v758_v4 = vand.u32 4294901760, %v180_v1  ;;  %v760_v5 = vand.u32 4294901760, %v179_v2  ;;  %v178_v6 = vld [vmem:[%s910_s1 + $0x20] sm:$0xff]  ;;  %v177_v7 = vld [vmem:[%s910_s1 + $0x18] sm:$0xff]  ;;  %v176_v8 = vld [vmem:[%s910_s1 + $0x10] sm:$0xff]  ;;  %p629_p11 = scmp.ne.s32.totalorder %s627_s11, %s628_s17  ;;  %p633_p0 = scmp.lt.s32.totalorder %s627_s11, %s912_s3 }
  0x15   : > { %v771_v9 = vand.u32 4294901760, %v178_v6  ;;  %v773_v10 = vand.u32 4294901760, %v177_v7  ;;  %v775_v11 = vand.u32 4294901760, %v176_v8  ;;  %v175_v12 = vld [vmem:[%s910_s1 + $0x8] sm:$0xff]  ;;  %v174_v16 = vld [vmem:[%s910_s1] sm:$0xff]  ;;  %s547_s20 = sshll.u32 %s920_s30, 3  ;;  %p634_p1 = scmp.lt.s32.totalorder %s632_s24, %s628_s17 }
  0x16   : > { %202 = vmatpush.msra.mxu0 %v756_v3  ;;  %v243_v13 = vsub.f32 %v181_v0, %v756_v3  ;;  %v249_v14 = vsub.f32 %v180_v1, %v758_v4  ;;  %351 = vmatpush.msra.mxu3 %v756_v3  ;;  %v255_v15 = vsub.f32 %v179_v2, %v760_v5  ;;  %v790_v19 = vand.u32 4294901760, %v175_v12  ;;  %s169_s26 = scalar_lea.vmem %s909_s0, %s547_s20  ;;  %v611_v0 = vld [vmem:[%s911_s2] ss:$0 sm:$0xff]  ;;  %s545_s30 = sshll.u32 %s162_s29, 4 }
  0x17   : > { %v261_v17 = vsub.f32 %v178_v6, %v771_v9  ;;  %v267_v18 = vsub.f32 %v177_v7, %v773_v10  ;;  %v273_v23 = vsub.f32 %v176_v8, %v775_v11  ;;  %v803_v25 = vand.u32 4294901760, %v174_v16  ;;  %v172_v31 = vld [vmem:[%s169_s26] sm:$0xff]  ;;  %v173_v32 = vld [vmem:[%s169_s26 + $0x8] sm:$0xff]  ;;  %s164_s8 = scalar_lea.vmem [#allocation2], %s545_s30  ;;  %p630_p12 = pnand %p629_p11, %p736_p5 }
  0x18   : > { %309 = vmatpush.msra.mxu2 %v243_v13  ;;  %204 = vmatpush.msra.mxu0 %v758_v4  ;;  %v793_v20 = vand.u32 4294901760, %v243_v13  ;;  %v795_v21 = vand.u32 4294901760, %v249_v14  ;;  %v797_v22 = vand.u32 4294901760, %v255_v15  ;;  %v279_v30 = vsub.f32 %v175_v12, %v790_v19  ;;  %s476_s9 = sshll.u32 %s164_s8, 4  ;;  %p635_p2 = por %p634_p1, %p633_p0  ;;  %s477_s9 = int_to_ptr.vmem [resolvable:$true] %s476_s9 }
  0x19   : > { %353 = vmatpush.msra.mxu3 %v758_v4  ;;  %v801_v24 = vand.u32 4294901760, %v261_v17  ;;  %v812_v29 = vand.u32 4294901760, %v267_v18  ;;  %v188_v36 = vsel %vm186_vm0, %v172_v31, 0  ;;  %v285_v38 = vsub.f32 %v174_v16, %v803_v25  ;;  %p631_p13 = pneg %p630_p12 }
  0x1a   : > { %312 = vmatpush.msra.mxu2 %v249_v14  ;;  %206 = vmatpush.msra.mxu0 %v760_v5  ;;  %v245_v26 = vsub.f32 %v243_v13, %v793_v20  ;;  %v251_v27 = vsub.f32 %v249_v14, %v795_v21  ;;  %v257_v28 = vsub.f32 %v255_v15, %v797_v22  ;;  %v820_v37 = vand.u32 4294901760, %v188_v36 }
  0x1b   : > { %355 = vmatpush.msra.mxu3 %v760_v5  ;;  %v263_v35 = vsub.f32 %v261_v17, %v801_v24  ;;  %v823_v39 = vand.u32 4294901760, %v273_v23  ;;  %v269_v41 = vsub.f32 %v267_v18, %v812_v29  ;;  %v191_v42 = vsel %vm186_vm0, %v173_v32, 0  ;;  %p636_p3 = pnand %p635_p2, %p631_p13 }
  0x1c   : > { %315 = vmatpush.msra.mxu2 %v255_v15  ;;  %208 = vmatpush.msra.mxu0 %v771_v9  ;;  %v246_v33 = vand.u32 4294901760, %v245_v26  ;;  %v252_v34 = vand.u32 4294901760, %v251_v27  ;;  %v258_v40 = vand.u32 4294901760, %v257_v28  ;;  %v218_v43 = vsub.f32 %v188_v36, %v820_v37 }
  0x1d   : > { %357 = vmatpush.msra.mxu3 %v771_v9  ;;  %v280_v44 = vand.u32 4294901760, %v279_v30  ;;  %v830_v45 = vand.u32 4294901760, %v191_v42  ;;  %v264_v46 = vand.u32 4294901760, %v263_v35  ;;  %v275_v48 = vsub.f32 %v273_v23, %v823_v39 }
  0x1e   : > { %247 = vmatpush.msra.mxu1 %v246_v33  ;;  %318 = vmatpush.msra.mxu2 %v261_v17  ;;  %v219_v47 = vand.u32 4294901760, %v218_v43  ;;  %v286_v49 = vand.u32 4294901760, %v285_v38  ;;  %v270_v51 = vand.u32 4294901760, %v269_v41 }
  0x1f   : > { %210 = vmatpush.msra.mxu0 %v773_v10  ;;  %359 = vmatpush.msra.mxu3 %v773_v10  ;;  %v226_v50 = vsub.f32 %v191_v42, %v830_v45  ;;  %v281_v53 = vsub.f32 %v279_v30, %v280_v44  ;;  %v276_v56 = vand.u32 4294901760, %v275_v48 }
  0x20   : > { %253 = vmatpush.msra.mxu1 %v252_v34  ;;  %321 = vmatpush.msra.mxu2 %v267_v18  ;;  %v220_v52 = vsub.f32 %v218_v43, %v219_v47  ;;  %v287_v57 = vsub.f32 %v285_v38, %v286_v49 }
  0x21   : > { %212 = vmatpush.msra.mxu0 %v775_v11  ;;  %361 = vmatpush.msra.mxu3 %v775_v11  ;;  %v227_v54 = vand.u32 4294901760, %v226_v50  ;;  %v282_v58 = vand.u32 4294901760, %v281_v53 }
  0x22   : > { %259 = vmatpush.msra.mxu1 %v258_v40  ;;  %324 = vmatpush.msra.mxu2 %v273_v23  ;;  %v221_v55 = vand.u32 4294901760, %v220_v52  ;;  %v288_v60 = vand.u32 4294901760, %v287_v57 }
  0x23   : > { %214 = vmatpush.msra.mxu0 %v790_v19  ;;  %363 = vmatpush.msra.mxu3 %v790_v19  ;;  %v228_v59 = vsub.f32 %v226_v50, %v227_v54 }
  0x24   : > { %265 = vmatpush.msra.mxu1 %v264_v46  ;;  %327 = vmatpush.msra.mxu2 %v279_v30 }
  0x25   : > { %216 = vmatpush.msra.mxu0 %v803_v25  ;;  %365 = vmatpush.msra.mxu3 %v803_v25  ;;  %v229_v61 = vand.u32 4294901760, %v228_v59 }
  0x26   : > { %271 = vmatpush.msra.mxu1 %v270_v51  ;;  %330 = vmatpush.msra.mxu2 %v285_v38 }
  0x27   : > { %222 = vmatmul.f32.vlgmr.msra.gmra.mxu0 %v221_v55  ;;  %333 = vmatmul.f32.vlgmr.msra.gmra.mxu2 %v218_v43 }
  0x28   : > { %390 = vmatpush.msrb.mxu0 %v793_v20  ;;  %554 = vmatpush.msrb.mxu2 %v793_v20 }
  0x29   : > { %277 = vmatpush.msra.mxu1 %v276_v56  ;;  %369 = vmatmul.f32.vlgmr.msra.gmra.mxu3 %v219_v47 }
  0x2a   : > { %394 = vmatpush.msrb.mxu0 %v795_v21  ;;  %555 = vmatpush.msrb.mxu2 %v795_v21 }
  0x2b   : > { %562 = vmatpush.msrb.mxu3 %v756_v3  ;;  %283 = vmatpush.msra.mxu1 %v282_v58 }
  0x2c   : > { %398 = vmatpush.msrb.mxu0 %v797_v22  ;;  %556 = vmatpush.msrb.mxu2 %v797_v22 }
  0x2d   : > { %563 = vmatpush.msrb.mxu3 %v758_v4  ;;  %289 = vmatpush.msra.mxu1 %v288_v60 }
  0x2e   : > { %291 = vmatmul.f32.vlgmr.msra.gmra.mxu1 %v820_v37  ;;  %402 = vmatpush.msrb.mxu0 %v801_v24 }
  0x2f   : > { %557 = vmatpush.msrb.mxu2 %v801_v24  ;;  %564 = vmatpush.msrb.mxu3 %v760_v5 }
  0x30   : > { %230 = vmatmul.f32.gmra.mxu0 %v229_v61  ;;  %437 = vmatpush.msrb.mxu1 %v756_v3 }
  0x31   : > { %338 = vmatmul.f32.gmra.mxu2 %v226_v50  ;;  %406 = vmatpush.msrb.mxu0 %v812_v29 }
  0x32   : > { %558 = vmatpush.msrb.mxu2 %v812_v29  ;;  %565 = vmatpush.msrb.mxu3 %v771_v9 }
  0x33   : > { %439 = vmatpush.msrb.mxu1 %v758_v4  ;;  %375 = vmatmul.f32.gmra.mxu3 %v227_v54 }
  0x34   : > { %410 = vmatpush.msrb.mxu0 %v823_v39  ;;  %559 = vmatpush.msrb.mxu2 %v823_v39 }
  0x35   : > { %566 = vmatpush.msrb.mxu3 %v773_v10  ;;  %441 = vmatpush.msrb.mxu1 %v760_v5 }
  0x36   : > { %414 = vmatpush.msrb.mxu0 %v280_v44  ;;  %560 = vmatpush.msrb.mxu2 %v280_v44 }
  0x37   : > { %567 = vmatpush.msrb.mxu3 %v775_v11  ;;  %443 = vmatpush.msrb.mxu1 %v771_v9 }
  0x38   : > { %295 = vmatmul.f32.gmra.mxu1 %v830_v45  ;;  %418 = vmatpush.msrb.mxu0 %v286_v49 }
  0x39   : > { %561 = vmatpush.msrb.mxu2 %v286_v49  ;;  %568 = vmatpush.msrb.mxu3 %v790_v19 }
  0x3a   : > { %420 = vmatmul.f32.vlgmr.msrb.gmra.mxu0 %v820_v37  ;;  %445 = vmatpush.msrb.mxu1 %v773_v10 }
  0x3b   : > { %424 = vmatmul.f32.vlgmr.msrb.gmra.mxu2 %v830_v45  ;;  %569 = vmatpush.msrb.mxu3 %v803_v25 }
  0x3c   : > { %447 = vmatpush.msrb.mxu1 %v775_v11  ;;  %457 = vmatmul.f32.vlgmr.msrb.gmra.mxu3 %v830_v45 }
  0x3e   : > { %449 = vmatpush.msrb.mxu1 %v790_v19 }
  0x40   : > { %451 = vmatpush.msrb.mxu1 %v803_v25 }
  0x41   : > { %453 = vmatmul.f32.vlgmr.msrb.gmra.mxu1 %v820_v37 }
  0xa4   : > { %v223_v62 = vpop.f32.mrf.mxu0 }
  0xa5   : > { %v224_v3 = vadd.f32 %v611_v0, %v223_v62 }
  0xaa   : > { %v334_v63 = vpop.f32.mrf.mxu2 }
  0xab   : > { %v292_v1 = vpop.f32.mrf.mxu1 }
  0xac   : > { %v370_v2 = vpop.f32.mrf.mxu3  ;;  %v293_v6 = vadd.f32 %v292_v1, %v224_v3 }
  0xad   : > { %v231_v4 = vpop.f32.mrf.mxu0 }
  0xae   : > { %v232_v5 = vadd.f32 %v611_v0, %v231_v4  ;;  %v335_v11 = vadd.f32 %v334_v63, %v293_v6 }
  0xb0   : > { %v371_v14 = vadd.f32 %v370_v2, %v335_v11 }
  0xb4   : > { %v339_v7 = vpop.f32.mrf.mxu2 }
  0xb5   : > { %v296_v8 = vpop.f32.mrf.mxu1 }
  0xb6   : > { %v297_v9 = vadd.f32 %v296_v8, %v232_v5  ;;  %v376_v10 = vpop.f32.mrf.mxu3 }
  0xb7   : > { %v421_v13 = vpop.f32.mrf.mxu0 }
  0xb8   : > { %v340_v12 = vadd.f32 %v339_v7, %v297_v9  ;;  %v422_v15 = vadd.f32 %v421_v13, %v371_v14 }
  0xba   : > { %v377_v16 = vadd.f32 %v376_v10, %v340_v12 }
  0xbe   : > { %v425_v17 = vpop.f32.mrf.mxu2  ;;  %v454_v18 = vpop.f32.mrf.mxu1 }
  0xbf   : > { %v426_v19 = vadd.f32 %v425_v17, %v377_v16  ;;  %v455_v20 = vadd.f32 %v454_v18, %v422_v15  ;;  %v458_v21 = vpop.f32.mrf.mxu3 }
  0xc1   : > { %461 = vst [vmem:[%s164_s8] sm:$0xff] %v455_v20  ;;  %v459_v22 = vadd.f32 %v458_v21, %v426_v19 }
  0xc3   : > { %462 = vst [vmem:[%s164_s8 + $0x8] sm:$0xff] %v459_v22 }
  0xc4   : > { %639 = shalt.err (!%p636_p3)
}
  0xc5   : > { %s676_s27 = smov 128   ;;  %s677_s28 = smov 8  }
  0xc6   : > { %570 = dma.vmem_to_hbm [thread:$0]  (%p736_p5), %s477_s9, 256, %s479_s10, %s464_s16, %s676_s27, %s676_s27, %s677_s28  }
  0xc7 PF: > { %p576_p4 = scmp.ge.s32.totalorder %s674_s15, 2  ;;  %s493_s29 = sand.u32 1, %s662_s12  }
  0xc8   : > { %s494_s30 = scalar_lea.sflag [#allocation3], %s493_s29 }
  0xc9   : > { %p573_p7 = pnand %p576_p4, %p740_p6 }
  0xcb   : > { %p574_p8 = pneg %p573_p7 }
  0xcd   : > { %657 = dma.done.wait (%p574_p8), %s494_s30, 256  }
  0xce   : > { %659 = vsyncadd (%p574_p8), %s494_s30, 4294967040  ;;  %p13_p9 = scmp.ge.s32.totalorder %s723_s18, 4   ;;  %s915_s12 = smov %s666_s13 }
  0xcf   : > { %s916_s13 = smov %s670_s14  ;;  %s917_s14 = smov %s734_s21 }
  0xd0   : > { %s918_s15 = smov %s723_s18  ;;  %15 = sbr.rel (!%p13_p9) target bundleno = 3 (0x3), region = 67 }
  0xd5   :  { %500 = vsyncpa [#allocation3], 1 }
  0xd6   :  { %502 = vsyncpa [#allocation3 + $0x1], 1 }

</bundles_post_ra>
